<compile_context>
chip_gen: v7x
topology: tpu7x:2x2x1
jax: 0.10.0
libtpu: 0.0.40
codegen_flags: <defaults>
</compile_context>

<pallas_src>
import jax
import jax.numpy as jnp
from jax.experimental import pallas as pl
from jax.experimental.pallas import tpu as pltpu


# ----------------------------- Pallas kernel ------------------------------- #

def wordrepr_fused_kernel(word_ref, case_ref, char_ref, w_ref, b_ref, o_ref):
    """One block of BLOCK_N output rows.

    word_ref: (BN, Dw)      f32
    case_ref: (BN, Dk)      f32
    char_ref: (BN*T, Cin)   bf16  -- rows flattened (row, t), channel-last, unpadded
    w_ref:    (3*Cin, H)    bf16  -- stacked conv taps [w0; w1; w2]
    b_ref:    (1, H)        f32
    o_ref:    (BN, Dw+H+Dk) f32
    """
    bn = word_ref.shape[0]
    rows, cin = char_ref.shape
    t_len = rows // bn                                   # conv length per row

    x = char_ref[...]                                    # (BN*T, Cin) bf16

    # Shift-by-one neighbours along the flattened (row, t) axis.
    zero_row = jnp.zeros((1, cin), x.dtype)
    x_prev = jnp.concatenate([zero_row, x[:rows - 1, :]], axis=0)   # x[f-1]
    x_next = jnp.concatenate([x[1:, :], zero_row], axis=0)          # x[f+1]

    # Zero the taps that crossed a conv-row boundary -- this IS the k=3,
    # padding=1 zero padding, done in-register (no wrapper jnp.pad HBM pass).
    # Every block starts at t == 0, so block edges are row boundaries too.
    t_idx = jax.lax.broadcasted_iota(jnp.int32, (rows, cin), 0) % t_len
    x_prev = jnp.where(t_idx == 0, jnp.zeros_like(x_prev), x_prev)
    x_next = jnp.where(t_idx == t_len - 1, jnp.zeros_like(x_next), x_next)

    # im2col slab -> single MXU matmul with f32 accumulation.
    xi = jnp.concatenate([x_prev, x, x_next], axis=-1)              # (BN*T, 3*Cin)
    y = jnp.dot(xi, w_ref[...], preferred_element_type=jnp.float32)  # (BN*T, H) f32

    h = y.shape[-1]
    # Full-length max-pool per row; bias hoisted past the max (constant over T).
    pooled = jnp.max(y.reshape(bn, t_len, h), axis=1) + b_ref[...]   # (BN, H) f32

    # Fused torch.cat([word, char, case], dim=2): one lane slab store per block.
    o_ref[...] = jnp.concatenate([word_ref[...], pooled, case_ref[...]], axis=-1)


# ------------------------------ wrapper ------------------------------------ #

def _pick_block_rows(n_rows, target):
    """Largest divisor of n_rows that is <= target and 8-aligned (or == n_rows)."""
    for cand in range(min(target, n_rows), 0, -1):
        if n_rows % cand == 0 and (cand % 8 == 0 or cand == n_rows):
            return cand
    return n_rows


def word_repr_forward(params, inputs_word, inputs_char, inputs_case, *,
                      block_rows=256):
    """Mirrors WordRepr.forward (eval mode: all dropouts are identity)."""
    B, S = inputs_word.shape
    L = inputs_char.shape[-1]
    assert L == S, "literal torch view(B, S, -1) requires char_len == seq_len"

    word_emb = params["word_emb"]
    char_emb = params["char_emb"]
    case_emb = params["case_emb"]
    conv_w = params["char_cnn_w"]            # (H, Cin, 3) torch Conv1d layout
    conv_b = params["char_cnn_b"]            # (H,)

    Dw = word_emb.shape[1]
    Cin = char_emb.shape[1]
    H = conv_w.shape[0]
    Dk = case_emb.shape[1]
    Dtot = Dw + H + Dk
    N, T = B * S, S

    # Embedding gathers (XLA gather; no in-kernel equivalent needed).
    word2d = word_emb[inputs_word].reshape(N, Dw)                     # f32
    case2d = case_emb[inputs_case].reshape(N, Dk)                     # f32

    # torch's transpose(2,1) applied to the *index* tensor (tiny int32) instead of
    # the gathered activations; the gather then directly emits the conv layout
    # (B, L, S, Cin) in bf16.  Char row n == (b, l) matches output row
    # n == (b, s=l) because L == S, so no further transpose is needed.
    char2d = char_emb.astype(jnp.bfloat16)[jnp.swapaxes(inputs_char, 1, 2)]
    char2d = char2d.reshape(N * T, Cin)                               # bf16, free view

    # Stack the 3 conv taps into a single (3*Cin, H) weight -> one MXU push.
    w_stk = jnp.concatenate(
        [conv_w[:, :, 0].T, conv_w[:, :, 1].T, conv_w[:, :, 2].T],
        axis=0).astype(jnp.bfloat16)                                  # (3*Cin, H)
    b_row = conv_b.reshape(1, H).astype(jnp.float32)

    bn = _pick_block_rows(N, block_rows)
    grid = (N // bn,)

    out2d = pl.pallas_call(
        wordrepr_fused_kernel,
        out_shape=jax.ShapeDtypeStruct((N, Dtot), jnp.float32),
        grid=grid,
        in_specs=[
            pl.BlockSpec((bn, Dw), lambda i: (i, 0)),
            pl.BlockSpec((bn, Dk), lambda i: (i, 0)),
            pl.BlockSpec((bn * T, Cin), lambda i: (i, 0)),
            pl.BlockSpec((3 * Cin, H), lambda i: (0, 0)),   # conv weight (constant)
            pl.BlockSpec((1, H), lambda i: (0, 0)),         # conv bias   (constant)
        ],
        out_specs=pl.BlockSpec((bn, Dtot), lambda i: (i, 0)),
        compiler_params=pltpu.CompilerParams(
            dimension_semantics=("parallel",)),
    )(word2d, case2d, char2d, w_stk, b_row)

    return out2d.reshape(B, S, Dtot)


# ------------------------------ main ---------------------------------------- #

if __name__ == "__main__":
    # synthetic "opt"/"vocabs"
    B, S = 2, 8
    L = S                      # char_len == seq_len (required by literal views)
    word_vocab, char_vocab, case_vocab = 50, 30, 6
    word_emb_dim, char_emb_dim = 32, 16
    char_hidden_dim, case_emb_dim = 32, 8

    key = jax.random.PRNGKey(0)
    k = jax.random.split(key, 8)

    params = {
        "word_emb":   0.1 * jax.random.normal(k[0], (word_vocab, word_emb_dim), jnp.float32),
        "char_emb":   0.1 * jax.random.normal(k[1], (char_vocab, char_emb_dim), jnp.float32),
        "char_cnn_w": 0.1 * jax.random.normal(k[2], (char_hidden_dim, char_emb_dim, 3), jnp.float32),
        "char_cnn_b": 0.1 * jax.random.normal(k[3], (char_hidden_dim,), jnp.float32),
        "case_emb":   0.1 * jax.random.normal(k[4], (case_vocab, case_emb_dim), jnp.float32),
    }

    inputs_word = jax.random.randint(k[5], (B, S), 0, word_vocab, jnp.int32)
    inputs_char = jax.random.randint(k[6], (B, S, L), 0, char_vocab, jnp.int32)
    inputs_case = jax.random.randint(k[7], (B, S), 0, case_vocab, jnp.int32)

    out = word_repr_forward(params, inputs_word, inputs_char, inputs_case)
    out = jax.block_until_ready(out)
    assert out.shape == (B, S, word_emb_dim + char_hidden_dim + case_emb_dim)

    # Pure-JAX reference for the char branch (same bf16 inputs, f32 accumulation).
    ce = params["char_emb"].astype(jnp.bfloat16)[inputs_char]          # (B, S, L, E)
    ce = jnp.swapaxes(ce, 2, 1).reshape(B * L, S, char_emb_dim)        # (B*L, S, E)
    xp = jnp.pad(ce, ((0, 0), (1, 1), (0, 0)))
    w_bf = params["char_cnn_w"].astype(jnp.bfloat16)
    ref = sum(jnp.einsum("nte,he->nth", xp[:, j:j + S], w_bf[:, :, j],
                         preferred_element_type=jnp.float32)
              for j in range(3))
    ref = jnp.max(ref, axis=1) + params["char_cnn_b"][None, :]
    ref = ref.reshape(B, S, -1)

    assert jnp.allclose(out[:, :, :word_emb_dim],
                        params["word_emb"][inputs_word], atol=1e-6)
    assert jnp.allclose(out[:, :, word_emb_dim:word_emb_dim + char_hidden_dim],
                        ref, atol=2e-3), "char CNN mismatch"
    assert jnp.allclose(out[:, :, -case_emb_dim:],
                        params["case_emb"][inputs_case], atol=1e-6)

    print("KERNEL_OK")
</pallas_src>

<mosaic_0001>
module attributes {stable_mosaic.version = 11 : i64} {
  func.func @wordrepr_fused_kernel(%arg0: i32, %arg1: memref<16x32xf32, #tpu.memory_space<vmem>>, %arg2: memref<16x8xf32, #tpu.memory_space<vmem>>, %arg3: memref<128x16xbf16, #tpu.memory_space<vmem>>, %arg4: memref<48x32xbf16, #tpu.memory_space<vmem>>, %arg5: memref<1x32xf32, #tpu.memory_space<vmem>>, %arg6: memref<16x72xf32, #tpu.memory_space<vmem>>) attributes {dimension_semantics = [#tpu.dimension_semantics<parallel>], iteration_bounds = array<i64: 1>, scalar_prefetch = 0 : i64, scratch_operands = 0 : i64, tpu.core_type = #tpu.core_type<tc>, window_params = [{transform_indices = @transform_0, window_bounds = array<i64: 16, 32>}, {transform_indices = @transform_1, window_bounds = array<i64: 16, 8>}, {transform_indices = @transform_2, window_bounds = array<i64: 128, 16>}, {pipeline_mode = #tpu.pipeline_mode<synchronous>, transform_indices = @transform_3, window_bounds = array<i64: 48, 32>}, {pipeline_mode = #tpu.pipeline_mode<synchronous>, transform_indices = @transform_4, window_bounds = array<i64: 1, 32>}, {transform_indices = @transform_5, window_bounds = array<i64: 16, 72>}]} {
    %c0 = arith.constant 0 : index
    %c0_0 = arith.constant 0 : index
    %0 = vector.load %arg3[%c0, %c0_0] : memref<128x16xbf16, #tpu.memory_space<vmem>>, vector<128x16xbf16>
    %cst = arith.constant 0.000000e+00 : bf16
    %1 = vector.broadcast %cst : bf16 to vector<1x16xbf16>
    %2 = vector.extract_strided_slice %0 {offsets = [0, 0], sizes = [127, 16], strides = [1, 1]} : vector<128x16xbf16> to vector<127x16xbf16>
    %3 = tpu.concatenate %1, %2 in 0 : vector<1x16xbf16>, vector<127x16xbf16> -> vector<128x16xbf16>
    %4 = vector.extract_strided_slice %0 {offsets = [1, 0], sizes = [127, 16], strides = [1, 1]} : vector<128x16xbf16> to vector<127x16xbf16>
    %5 = tpu.concatenate %4, %1 in 0 : vector<127x16xbf16>, vector<1x16xbf16> -> vector<128x16xbf16>
    %6 = tpu.iota {dimensions = array<i32: 0>} : vector<128x16xi32>
    %c8_i32 = arith.constant 8 : i32
    %c0_i32 = arith.constant 0 : i32
    %7 = arith.cmpi eq, %c8_i32, %c0_i32 : i32
    %c1_i32 = arith.constant 1 : i32
    %8 = arith.select %7, %c1_i32, %c8_i32 : i32
    %9 = vector.broadcast %8 : i32 to vector<128x16xi32>
    %10 = arith.remsi %6, %9 : vector<128x16xi32>
    %c0_i32_1 = arith.constant 0 : i32
    %11 = vector.broadcast %c0_i32_1 : i32 to vector<128x16xi32>
    %12 = arith.cmpi ne, %10, %11 : vector<128x16xi32>
    %c0_i32_2 = arith.constant 0 : i32
    %13 = vector.broadcast %c0_i32_2 : i32 to vector<128x16xi32>
    %14 = arith.cmpi slt, %10, %13 : vector<128x16xi32>
    %c0_i32_3 = arith.constant 0 : i32
    %15 = arith.cmpi slt, %8, %c0_i32_3 : i32
    %16 = vector.broadcast %15 : i1 to vector<128x16xi1>
    %17 = vector.broadcast %16 : vector<128x16xi1> to vector<128x16xi1>
    %18 = arith.xori %14, %17 : vector<128x16xi1>
    %19 = arith.andi %18, %12 : vector<128x16xi1>
    %20 = vector.broadcast %8 : i32 to vector<128x16xi32>
    %21 = arith.addi %10, %20 : vector<128x16xi32>
    %22 = arith.select %19, %21, %10 : vector<128x16xi1>, vector<128x16xi32>
    %c0_i32_4 = arith.constant 0 : i32
    %23 = vector.broadcast %c0_i32_4 : i32 to vector<128x16xi32>
    %24 = arith.cmpi eq, %22, %23 : vector<128x16xi32>
    %cst_5 = arith.constant 0.000000e+00 : bf16
    %25 = vector.broadcast %cst_5 : bf16 to vector<128x16xbf16>
    %26 = arith.select %24, %25, %3 : vector<128x16xi1>, vector<128x16xbf16>
    %c7_i32 = arith.constant 7 : i32
    %27 = vector.broadcast %c7_i32 : i32 to vector<128x16xi32>
    %28 = arith.cmpi eq, %22, %27 : vector<128x16xi32>
    %cst_6 = arith.constant 0.000000e+00 : bf16
    %29 = vector.broadcast %cst_6 : bf16 to vector<128x16xbf16>
    %30 = arith.select %28, %29, %5 : vector<128x16xi1>, vector<128x16xbf16>
    %31 = tpu.concatenate %26, %0, %30 in 1 : vector<128x16xbf16>, vector<128x16xbf16>, vector<128x16xbf16> -> vector<128x48xbf16>
    %c0_7 = arith.constant 0 : index
    %c0_8 = arith.constant 0 : index
    %32 = vector.load %arg4[%c0_7, %c0_8] : memref<48x32xbf16, #tpu.memory_space<vmem>>, vector<48x32xbf16>
    %cst_9 = arith.constant dense<0.000000e+00> : vector<128x32xf32>
    %33 = tpu.matmul %31, %32, %cst_9 {dimension_numbers = #tpu.dot_dimension_numbers<[1], [0], [0], [1], [0, 0, 1, 1], [], []>} : vector<128x48xbf16>, vector<48x32xbf16>, vector<128x32xf32> -> vector<128x32xf32>
    %34 = vector.shape_cast %33 : vector<128x32xf32> to vector<16x8x32xf32>
    %cst_10 = arith.constant dense<0xFF800000> : vector<16x32xf32>
    %35 = vector.multi_reduction <maximumf>, %34, %cst_10 [1] : vector<16x8x32xf32> to vector<16x32xf32>
    %c0_11 = arith.constant 0 : index
    %c0_12 = arith.constant 0 : index
    %36 = vector.load %arg5[%c0_11, %c0_12] : memref<1x32xf32, #tpu.memory_space<vmem>>, vector<1x32xf32>
    %37 = vector.broadcast %36 : vector<1x32xf32> to vector<16x32xf32>
    %38 = arith.addf %35, %37 : vector<16x32xf32>
    %c0_13 = arith.constant 0 : index
    %c0_14 = arith.constant 0 : index
    %39 = vector.load %arg1[%c0_13, %c0_14] : memref<16x32xf32, #tpu.memory_space<vmem>>, vector<16x32xf32>
    %c0_15 = arith.constant 0 : index
    %c0_16 = arith.constant 0 : index
    %40 = vector.load %arg2[%c0_15, %c0_16] : memref<16x8xf32, #tpu.memory_space<vmem>>, vector<16x8xf32>
    %41 = tpu.concatenate %39, %38, %40 in 1 : vector<16x32xf32>, vector<16x32xf32>, vector<16x8xf32> -> vector<16x72xf32>
    %c0_17 = arith.constant 0 : index
    %c0_18 = arith.constant 0 : index
    %42 = vector.load %arg6[%c0_17, %c0_18] : memref<16x72xf32, #tpu.memory_space<vmem>>, vector<16x72xf32>
    tpu.vector_store %arg6[%c0_17, %c0_18], %41 {strides = array<i32>} : memref<16x72xf32, #tpu.memory_space<vmem>>, vector<16x72xf32>,
    return
  }
  func.func @transform_0(%arg0: i32) -> (i32, i32) {
    %c0_i32 = arith.constant 0 : i32
    %c0_i32_0 = arith.constant 0 : i32
    return %arg0, %c0_i32 : i32, i32
  }
  func.func @transform_1(%arg0: i32) -> (i32, i32) {
    %c0_i32 = arith.constant 0 : i32
    %c0_i32_0 = arith.constant 0 : i32
    return %arg0, %c0_i32 : i32, i32
  }
  func.func @transform_2(%arg0: i32) -> (i32, i32) {
    %c0_i32 = arith.constant 0 : i32
    %c0_i32_0 = arith.constant 0 : i32
    return %arg0, %c0_i32 : i32, i32
  }
  func.func @transform_3(%arg0: i32) -> (i32, i32) {
    %c0_i32 = arith.constant 0 : i32
    %c0_i32_0 = arith.constant 0 : i32
    %c0_i32_1 = arith.constant 0 : i32
    return %c0_i32, %c0_i32_0 : i32, i32
  }
  func.func @transform_4(%arg0: i32) -> (i32, i32) {
    %c0_i32 = arith.constant 0 : i32
    %c0_i32_0 = arith.constant 0 : i32
    %c0_i32_1 = arith.constant 0 : i32
    return %c0_i32, %c0_i32_0 : i32, i32
  }
  func.func @transform_5(%arg0: i32) -> (i32, i32) {
    %c0_i32 = arith.constant 0 : i32
    %c0_i32_0 = arith.constant 0 : i32
    return %arg0, %c0_i32 : i32, i32
  }
}

</mosaic_0001>

<bundles_post_ra>
// kernel: tpu_custom_call.1
= control target key start
LH: loop header
LB: loop body
LE: loop exit
PB: predicated region body
PF: predicated region fallthrough
CT: control target
= control target key end

     0   :  { %v190_v1 = vlaneseq  ;;  %s1140_s22 = smov 16   ;;  %vm155_vm0 = vsmask.f32 7424  ;;  %v1141_v38 = vmov 0   ;;  %s1743_s0 = inlined_call_operand.vmem [shape: f32[16,32], index: 0, kind: input, shape index: {}]   ;;  %s1744_s1 = inlined_call_operand.vmem [shape: f32[16,8], index: 1, kind: input, shape index: {}]   ;;  %s1745_s2 = inlined_call_operand.vmem [shape: bf16[128,16], index: 2, kind: input, shape index: {}]   ;;  %s1746_s3 = inlined_call_operand.vmem [shape: bf16[48,32], index: 3, kind: input, shape index: {}]   ;;  %s1747_s4 = inlined_call_operand.vmem [shape: f32[1,32], index: 4, kind: input, shape index: {}]   ;;  %s1748_s5 = inlined_call_operand.hbm [shape: f32[16,72], index: 5, kind: output, shape index: {}]  }
   0x1   :  { %v1180_v0 = vld [vmem:[%s1745_s2 + $0x8] sm:$0xff]   ;;  %v1185_v2 = vld [vmem:[%s1745_s2] sm:$0xff]   ;;  %v1217_v14 = vld [vmem:[%s1745_s2 + $0x30] sm:$0xff]  }
   0x2   :  { %577 = vrot.lane.b32.xlu1 %v1180_v0, %s1140_s22  ;;  %v89_v3 = vshrl.u32 %v1180_v0, 16  ;;  %v92_v4 = vshll.u32 %v1180_v0, 16  ;;  %575 = vrot.lane.b32.xlu0 %v1185_v2, %s1140_s22  ;;  %v85_v5 = vshll.u32 %v1185_v2, 16  ;;  %v1197_v6 = vld [vmem:[%s1745_s2 + $0x28] sm:$0xff]   ;;  %v1202_v7 = vld [vmem:[%s1745_s2 + $0x20] sm:$0xff]   ;;  %v82_v9 = vshrl.u32 %v1185_v2, 16 }
   0x3   :  { %v1209_v10 = vshrl.u32 %v190_v1, 7  ;;  %v124_v11 = vshll.u32 %v1197_v6, 16  ;;  %v113_v12 = vshrl.u32 %v1202_v7, 16  ;;  %v116_v13 = vshll.u32 %v1202_v7, 16  ;;  %v1251_v27 = vld [vmem:[%s1745_s2 + $0x10] sm:$0xff]   ;;  %v1299_v43 = vld [vmem:[%s1745_s2 + $0x38] sm:$0xff]  }
   0x4   :  { %v1206_v8 = vrot.slane %v89_v3, 7  ;;  %v121_v15 = vshrl.u32 %v1197_v6, 16  ;;  %v156_v18 = vrot.slane %v85_v5, 1  ;;  %v158_v21 = vrot.slane %v92_v4, 1  ;;  %v1113_v44 = vld [vmem:[%s1746_s3] sm:$0xff]   ;;  %v1114_v49 = vld [vmem:[%s1746_s3 + $0x8] sm:$0xff]  }
   0x5   :  { %v1223_v16 = vadd.s32 64, %v1209_v10  ;;  %v1226_v17 = vadd.s32 72, %v1209_v10  ;;  %v1234_v19 = vrot.slane %v116_v13, 1  ;;  %v170_v20 = vrot.slane %v124_v11, 1  ;;  %1070 = vmatprep.subr.bf16.mxu0 %v1113_v44  ;;  %1092 = vmatprep.subr.bf16.mxu1 %v1113_v44  ;;  %v1115_v54 = vld [vmem:[%s1746_s3 + $0x10] sm:$0xff]   ;;  %s1142_s3 = smov 32  }
   0x6   :  { %585 = vrot.lane.b32.xlu1 %v1197_v6, %s1140_s22  ;;  %583 = vrot.lane.b32.xlu0 %v1202_v7, %s1140_s22  ;;  %v1241_v22 = vadd.s32 8, %v1209_v10  ;;  %v157_v25 = vor.u32 %v156_v18, %v82_v9  ;;  %v211_v26 = vand.u32 7, %v1209_v10  ;;  %v132_v30 = vshll.u32 %v1217_v14, 16 }
   0x7   :  { %v267_v23 = vand.u32 7, %v1223_v16  ;;  %v274_v24 = vand.u32 7, %v1226_v17  ;;  %v169_v28 = vor.u32 %v1234_v19, %v113_v12  ;;  %v1258_v31 = vrot.slane %v121_v15, 7  ;;  %1071 = vmatpush3.bf16.msra.mxu0 %v1113_v44  ;;  %1095 = vmatpush3.bf16.msra.mxu1 %v1113_v44 }
   0x8   :  { %v218_v29 = vand.u32 7, %v1241_v22  ;;  %vm1270_vm3 = vcmp.eq.s32.totalorder %v211_v26, 7  ;;  %v172_v35 = vor.u32 %v170_v20, %v121_v15  ;;  %v1282_v36 = vrot.slane %v132_v30, 1  ;;  %1072 = vmatprep.subr.bf16.mxu0 %v1114_v49  ;;  %1093 = vmatprep.subr.bf16.mxu1 %v1114_v49  ;;  %v1349_v15 = vld [vmem:[%s1745_s2 + $0x18] sm:$0xff]  }
   0x9   :  { %vm495_vm1 = vcmp.eq.s32.totalorder %v267_v23, 7  ;;  %vm1264_vm2 = vcmp.eq.s32.totalorder %v274_v24, 7  ;;  %v1285_v37 = vadd.s32 80, %v1209_v10  ;;  %v159_v40 = vsel %vm155_vm0, %v157_v25, %v158_v21  ;;  %vm503_vm7 = vmpackc.low %vm1270_vm3, %vm1270_vm3 }
   0xa   :  { %vm511_vm4 = vmpackc.low %vm495_vm1, %vm495_vm1  ;;  %vm1276_vm5 = vcmp.eq.s32.totalorder %v218_v29, 7  ;;  %v1293_v41 = vadd.s32 88, %v1209_v10  ;;  %v1754_v42 = vshll.u32 %v1251_v27, 16  ;;  %v171_v45 = vsel %vm155_vm0, %v169_v28, %v170_v20 }
   0xb   :  { %vm512_vm6 = vmpackc.low %vm1264_vm2, %vm1264_vm2  ;;  %v527_v39 = vsel %vm511_vm4, 65537, %v1141_v38  ;;  %v281_v47 = vand.u32 7, %v1285_v37  ;;  %v1311_v48 = vadd.s32 16, %v1209_v10  ;;  %v519_v51 = vsel %vm503_vm7, 65537, %v1141_v38  ;;  %1073 = vmatpush3.bf16.msra.mxu0 %v1114_v49  ;;  %1096 = vmatpush3.bf16.msra.mxu1 %v1114_v49 }
   0xc   :  { %v528_v46 = vsel %vm512_vm6, 65537, %v1141_v38  ;;  %vm504_vm8 = vmpackc.low %vm1276_vm5, %vm1276_vm5  ;;  %v288_v52 = vand.u32 7, %v1293_v41  ;;  %v161_v53 = vrot.slane %v1754_v42, 1  ;;  %v1330_v56 = vadd.s32 24, %v1209_v10 }
   0xd   :  { %v1043_v50 = vcombine.low %v527_v39, %v528_v46  ;;  %v520_v55 = vsel %vm504_vm8, 65537, %v1141_v38  ;;  %vm497_vm9 = vcmp.eq.s32.totalorder %v281_v47, 7  ;;  %v225_v57 = vand.u32 7, %v1311_v48 }
   0xe   :  { %v1039_v58 = vcombine.low %v519_v51, %v520_v55  ;;  %vm498_vm11 = vcmp.eq.s32.totalorder %v288_v52, 7  ;;  %vm513_vm12 = vmpackc.low %vm497_vm9, %vm497_vm9  ;;  %v160_v59 = vor.u32 %v158_v21, %v89_v3  ;;  %v232_v62 = vand.u32 7, %v1330_v56 }
   0xf   :  { %vm563_vm10 = vcmp.ne.s16.totalorder %v1043_v50, 0  ;;  %vm514_vm13 = vmpackc.low %vm498_vm11, %vm498_vm11  ;;  %v529_v61 = vsel %vm513_vm12, 65537, %v1141_v38  ;;  %vm489_vm14 = vcmp.eq.s32.totalorder %v225_v57, 7  ;;  %v174_v63 = vsel %vm155_vm0, %v172_v35, %v1282_v36 }
  0x10   :  { %v571_v60 = vsel %vm563_vm10, 0, %v171_v45  ;;  %vm559_vm15 = vcmp.ne.s16.totalorder %v1039_v58, 0  ;;  %v530_v1 = vsel %vm514_vm13, 65537, %v1141_v38  ;;  %vm505_vm1 = vmpackc.low %vm489_vm14, %vm489_vm14  ;;  %v1750_v3 = vshll.u32 %v1299_v43, 16 }
  0x11   :  { %607 = vrot.lane.b32.xlu1 %v571_v60, %s1142_s3  ;;  %v567_v18 = vsel %vm559_vm15, 0, %v159_v40  ;;  %v1044_v20 = vcombine.low %v529_v61, %v530_v1  ;;  %vm490_vm2 = vcmp.eq.s32.totalorder %v232_v62, 7  ;;  %v521_v21 = vsel %vm505_vm1, 65537, %v1141_v38 }
  0x12   :  { %10 = vsyncpa [#allocation3], 0  ;;  %599 = vrot.lane.b32.xlu0 %v567_v18, %s1142_s3  ;;  %v162_v25 = vsel %vm155_vm0, %v160_v59, %v161_v53  ;;  %v105_v28 = vshrl.u32 %v1349_v15, 16  ;;  %v129_v32 = vshrl.u32 %v1217_v14, 16  ;;  %v1359_v33 = vadd.s32 96, %v1209_v10  ;;  %1074 = vmatprep.subr.bf16.mxu0 %v1115_v54  ;;  %s1143_s20 = smov 64  }
  0x13   :  { %vm506_vm3 = vmpackc.low %vm490_vm2, %vm490_vm2  ;;  %vm564_vm4 = vcmp.ne.s16.totalorder %v1044_v20, 0  ;;  %v1363_v35 = vadd.s32 104, %v1209_v10  ;;  %v97_v39 = vshrl.u32 %v1251_v27, 16  ;;  %1094 = vmatprep.subr.bf16.mxu1 %v1115_v54  ;;  %v1749_v45 = vshll.u32 %v1349_v15, 16  ;;  %1075 = vmatpush3.bf16.msra.mxu0 %v1115_v54  ;;  %s1144_s25 = smov [#allocation2]  }
  0x14   :  { %v522_v34 = vsel %vm506_vm3, 65537, %v1141_v38  ;;  %v572_v40 = vsel %vm564_vm4, 0, %v174_v63  ;;  %v176_v46 = vrot.slane %v1750_v3, 1  ;;  %v1370_v49 = vrot.slane %v129_v32, 7  ;;  %1097 = vmatpush3.bf16.msra.mxu1 %v1115_v54 }
  0x15   :  { %v1040_v44 = vcombine.low %v521_v21, %v522_v34  ;;  %609 = vrot.lane.b32.xlu1 %v572_v40, %s1142_s3  ;;  %v175_v50 = vor.u32 %v1282_v36, %v129_v32  ;;  %v295_v51 = vand.u32 7, %v1359_v33  ;;  %v302_v55 = vand.u32 7, %v1363_v35 }
  0x16   :  { %v1375_v58 = vrot.slane %v97_v39, 7  ;;  %v163_v59 = vor.u32 %v161_v53, %v97_v39  ;;  %v1378_v60 = vadd.s32 32, %v1209_v10  ;;  %v1389_v63 = vadd.s32 40, %v1209_v10 }
  0x17   :  { %vm560_vm5 = vcmp.ne.s16.totalorder %v1040_v44, 0  ;;  %vm499_vm6 = vcmp.eq.s32.totalorder %v295_v51, 7  ;;  %vm1384_vm7 = vcmp.eq.s32.totalorder %v302_v55, 7  ;;  %v164_v53 = vrot.slane %v1749_v45, 1 }
  0x18   :  { %v568_v61 = vsel %vm560_vm5, 0, %v162_v25  ;;  %vm515_vm8 = vmpackc.low %vm499_vm6, %vm499_vm6  ;;  %v1752_v54 = vand.u32 7, %v1378_v60  ;;  %v137_v1 = vshrl.u32 %v1299_v43, 16  ;;  %vm187_vm9 = vcmask 1047552  }
  0x19   :  { %601 = vrot.lane.b32.xlu0 %v568_v61, %s1142_s3  ;;  %587 = vrot.lane.b32.xlu1 %v1217_v14, %s1140_s22  ;;  %vm516_vm10 = vmpackc.low %vm1384_vm7, %vm1384_vm7  ;;  %v531_v18 = vsel %vm515_vm8, 65537, %v1141_v38  ;;  %v1751_v20 = vand.u32 7, %v1389_v63  ;;  %v1404_v21 = vadd.s32 112, %v1209_v10  ;;  %v1407_v25 = vadd.s32 120, %v1209_v10 }
  0x1a   :  { %v177_v32 = vsel %vm155_vm0, %v175_v50, %v176_v46  ;;  %v532_v34 = vsel %vm516_vm10, 65537, %v1141_v38  ;;  %vm491_vm11 = vcmp.eq.s32.totalorder %v1752_v54, 7  ;;  %v178_v39 = vor.u32 %v176_v46, %v137_v1  ;;  %vm1416_vm12 = vmand %vm187_vm9, %vm155_vm0 }
  0x1b   :  { %v1045_v44 = vcombine.low %v531_v18, %v532_v34  ;;  %vm492_vm13 = vcmp.eq.s32.totalorder %v1751_v20, 7  ;;  %vm507_vm14 = vmpackc.low %vm491_vm11, %vm491_vm11  ;;  %v1753_v50 = vand.u32 7, %v1404_v21  ;;  %v316_v61 = vand.u32 7, %v1407_v25 }
  0x1c   :  { %v165_v36 = vsel %vm155_vm0, %v163_v59, %v164_v53  ;;  %vm508_vm15 = vmpackc.low %vm492_vm13, %vm492_vm13  ;;  %v523_v46 = vsel %vm507_vm14, 65537, %v1141_v38  ;;  %v166_v45 = vor.u32 %v164_v53, %v105_v28  ;;  %v1431_v18 = vadd.s32 48, %v1209_v10 }
  0x1d   :  { %579 = vrot.lane.b32.xlu0 %v1251_v27, %s1140_s22  ;;  %589 = vrot.lane.b32.xlu1 %v1299_v43, %s1140_s22  ;;  %vm1435_vm1 = vcmp.ne.s16.totalorder %v1045_v44, 0  ;;  %v524_v3 = vsel %vm508_vm15, 65537, %v1141_v38  ;;  %vm501_vm2 = vcmp.eq.s32.totalorder %v1753_v50, 7  ;;  %vm502_vm3 = vcmp.eq.s32.totalorder %v316_v61, 7 }
  0x1e   :  { %v573_v59 = vsel %vm1435_vm1, 0, %v177_v32  ;;  %v1041_v53 = vcombine.low %v523_v46, %v524_v3  ;;  %v189_v20 = vsel %vm1416_vm12, %v178_v39, 0  ;;  %vm517_vm4 = vmpackc.low %vm501_vm2, %vm501_vm2  ;;  %v1449_v44 = vadd.s32 56, %v1209_v10 }
  0x1f   :  { %vm518_vm5 = vmpackc.low %vm502_vm3, %vm502_vm3  ;;  %v533_v54 = vsel %vm517_vm4, 65537, %v1141_v38  ;;  %v168_v50 = vsel %vm155_vm0, %v166_v45, %v1234_v19  ;;  %v253_v42 = vand.u32 7, %v1431_v18  ;;  %vm401_vm6 = vcmp.eq.s32.totalorder %v225_v57, 0 }
  0x20   :  { %vm1459_vm7 = vcmp.ne.s16.totalorder %v1041_v53, 0  ;;  %v534_v32 = vsel %vm518_vm5, 65537, %v1141_v38  ;;  %v260_v39 = vand.u32 7, %v1449_v44  ;;  %vm402_vm8 = vcmp.eq.s32.totalorder %v232_v62, 0  ;;  %vm417_vm0 = vmpackc.low %vm401_vm6, %vm401_vm6 }
  0x21   :  { %581 = vrot.lane.b32.xlu0 %v1349_v15, %s1140_s22  ;;  %611 = vrot.lane.b32.xlu1 %v573_v59, %s1142_s3  ;;  %v569_v19 = vsel %vm1459_vm7, 0, %v165_v36  ;;  %v1046_v48 = vcombine.low %v533_v54, %v534_v32  ;;  %vm493_vm9 = vcmp.eq.s32.totalorder %v253_v42, 7  ;;  %vm418_vm10 = vmpackc.low %vm402_vm8, %vm402_vm8  ;;  %v433_v57 = vsel %vm417_vm0, 65537, %v1141_v38 }
  0x22   :  { %vm494_vm11 = vcmp.eq.s32.totalorder %v260_v39, 7  ;;  %vm509_vm12 = vmpackc.low %vm493_vm9, %vm493_vm9  ;;  %vm80_vm13 = vsmask.f32 256  ;;  %v434_v56 = vsel %vm418_vm10, 65537, %v1141_v38  ;;  %v84_v62 = vrot.slane %v82_v9, 7 }
  0x23   :  { %vm566_vm14 = vcmp.ne.s16.totalorder %v1046_v48, 0  ;;  %vm510_vm15 = vmpackc.low %vm494_vm11, %vm494_vm11  ;;  %v525_v45 = vsel %vm509_vm12, 65537, %v1141_v38  ;;  %v1032_v54 = vcombine.low %v433_v57, %v434_v56  ;;  %v94_v40 = vor.u32 %v92_v4, %v1206_v8 }
  0x24   :  { %v574_v36 = vsel %vm566_vm14, 0, %v189_v20  ;;  %v526_v46 = vsel %vm510_vm15, 65537, %v1141_v38  ;;  %vm152_vm1 = vcmask 1040384   ;;  %vm399_vm2 = vcmp.eq.s32.totalorder %v211_v26, 0 }
  0x25   :  { %603 = vrot.lane.b32.xlu0 %v569_v19, %s1142_s3  ;;  %613 = vrot.lane.b32.xlu1 %v574_v36, %s1142_s3  ;;  %v1042_v9 = vcombine.low %v525_v45, %v526_v46  ;;  %vm1487_vm3 = vcmp.ne.s16.totalorder %v1032_v54, 0  ;;  %v1492_v59 = vsel %vm80_vm13, %v84_v62, %v94_v40  ;;  %vm1495_vm4 = vmand %vm152_vm1, %vm80_vm13  ;;  %vm400_vm5 = vcmp.eq.s32.totalorder %v218_v29, 0 }
  0x26   :  { %v480_v4 = vsel %vm1487_vm3, 0, %v1492_v59  ;;  %vm415_vm6 = vmpackc.low %vm399_vm2, %vm399_vm2  ;;  %v87_v10 = vor.u32 %v85_v5, %v84_v62  ;;  %v115_v26 = vrot.slane %v113_v12, 7  ;;  %v126_v20 = vor.u32 %v124_v11, %v1258_v31 }
  0x27   :  { %vm562_vm7 = vcmp.ne.s16.totalorder %v1042_v9, 0  ;;  %vm416_vm8 = vmpackc.low %vm400_vm5, %vm400_vm5  ;;  %v431_v22 = vsel %vm415_vm6, 65537, %v1141_v38  ;;  %vm409_vm0 = vcmp.eq.s32.totalorder %v281_v47, 0  ;;  %vm410_vm9 = vcmp.eq.s32.totalorder %v288_v52, 0 }
  0x28   :  { %v570_v29 = vsel %vm562_vm7, 0, %v168_v50  ;;  %v432_v2 = vsel %vm416_vm8, 65537, %v1141_v38  ;;  %v154_v5 = vsel %vm1495_vm4, 0, %v87_v10  ;;  %v1520_v12 = vsel %vm80_vm13, %v115_v26, %v126_v20  ;;  %vm425_vm10 = vmpackc.low %vm409_vm0, %vm409_vm0 }
  0x29   :  { %605 = vrot.lane.b32.xlu0 %v570_v29, %s1142_s3  ;;  %v1031_v6 = vcombine.low %v431_v22, %v432_v2  ;;  %vm426_vm11 = vmpackc.low %vm410_vm9, %vm410_vm9  ;;  %v441_v11 = vsel %vm425_vm10, 65537, %v1141_v38  ;;  %v107_v37 = vrot.slane %v105_v28, 7  ;;  %v118_v41 = vor.u32 %v116_v13, %v115_v26 }
  0x2a   :  { %v442_v47 = vsel %vm426_vm11, 65537, %v1141_v38  ;;  %vm407_vm12 = vcmp.eq.s32.totalorder %v267_v23, 0  ;;  %vm408_vm14 = vcmp.eq.s32.totalorder %v274_v24, 0  ;;  %v139_v52 = vrot.slane %v137_v1, 7 }
  0x2b   :  { %vm471_vm15 = vcmp.ne.s16.totalorder %v1031_v6, 0  ;;  %v1036_v50 = vcombine.low %v441_v11, %v442_v47  ;;  %v1536_v53 = vsel %vm80_vm13, %v107_v37, %v118_v41  ;;  %vm423_vm1 = vmpackc.low %vm407_vm12, %vm407_vm12  ;;  %v134_v13 = vor.u32 %v132_v30, %v1370_v49 }
  0x2c   :  { %v1538_v28 = vsel %vm471_vm15, 0, %v154_v5  ;;  %vm424_vm2 = vmpackc.low %vm408_vm14, %vm408_vm14  ;;  %v439_v7 = vsel %vm423_vm1, 65537, %v1141_v38  ;;  %vm411_vm4 = vcmp.eq.s32.totalorder %v295_v51, 0  ;;  %vm412_vm6 = vcmp.eq.s32.totalorder %v302_v55, 0 }
  0x2d   :  { %vm1546_vm5 = vcmp.ne.s16.totalorder %v1036_v50, 0  ;;  %v440_v17 = vsel %vm424_vm2, 65537, %v1141_v38  ;;  %vm427_vm7 = vmpackc.low %vm411_vm4, %vm411_vm4  ;;  %v1775_v23 = vshll.u32 %v1251_v27, 16  ;;  %v1561_v33 = vsel %vm80_vm13, %v1258_v31, %v134_v13 }
  0x2e   :  { %v484_v14 = vsel %vm1546_vm5, 0, %v1520_v12  ;;  %v1035_v30 = vcombine.low %v439_v7, %v440_v17  ;;  %vm428_vm8 = vmpackc.low %vm412_vm6, %vm412_vm6  ;;  %v443_v51 = vsel %vm427_vm7, 65537, %v1141_v38  ;;  %v1776_v27 = vand.u32 7, %v1378_v60 }
  0x2f   :  { %v102_v24 = vor.u32 %v1775_v23, %v1375_v58  ;;  %v444_v35 = vsel %vm428_vm8, 65537, %v1141_v38  ;;  %v1777_v1 = vand.u32 7, %v1389_v63  ;;  %v1780_v32 = vshll.u32 %v1299_v43, 16 }
  0x30   :  { %vm403_vm0 = vcmp.eq.s32.totalorder %v1776_v27, 0  ;;  %vm1573_vm10 = vcmp.ne.s16.totalorder %v1035_v30, 0  ;;  %v1037_v31 = vcombine.low %v443_v51, %v444_v35  ;;  %v1781_v48 = vand.u32 7, %v1404_v21 }
  0x31   :  { %v1567_v55 = vsel %vm80_vm13, %v1206_v8, %v102_v24  ;;  %vm404_vm9 = vcmp.eq.s32.totalorder %v1777_v1, 0  ;;  %vm419_vm11 = vmpackc.low %vm403_vm0, %vm403_vm0  ;;  %v142_v19 = vor.u32 %v1780_v32, %v139_v52  ;;  %v483_v8 = vsel %vm1573_vm10, 0, %v1536_v53 }
  0x32   :  { %vm413_vm12 = vcmp.eq.s32.totalorder %v1781_v48, 0  ;;  %vm420_vm14 = vmpackc.low %vm404_vm9, %vm404_vm9  ;;  %v435_v60 = vsel %vm419_vm11, 65537, %v1141_v38  ;;  %vm414_vm15 = vcmp.eq.s32.totalorder %v316_v61, 0  ;;  %v1782_v63 = vshll.u32 %v1349_v15, 16 }
  0x33   :  { %vm1589_vm1 = vcmp.ne.s16.totalorder %v1037_v31, 0  ;;  %v436_v43 = vsel %vm420_vm14, 65537, %v1141_v38  ;;  %v143_v21 = vsel %vm80_vm13, %v1370_v49, %v142_v19  ;;  %vm429_vm2 = vmpackc.low %vm413_vm12, %vm413_vm12  ;;  %vm405_vm4 = vcmp.eq.s32.totalorder %v253_v42, 0 }
  0x34   :  { %v110_v57 = vor.u32 %v1782_v63, %v107_v37  ;;  %v485_v25 = vsel %vm1589_vm1, 0, %v1561_v33  ;;  %v1033_v61 = vcombine.low %v435_v60, %v436_v43  ;;  %vm430_vm5 = vmpackc.low %vm414_vm15, %vm414_vm15  ;;  %v445_v15 = vsel %vm429_vm2, 65537, %v1141_v38 }
  0x35   :  { %v446_v45 = vsel %vm430_vm5, 65537, %v1141_v38  ;;  %vm406_vm6 = vcmp.eq.s32.totalorder %v260_v39, 0  ;;  %vm421_vm7 = vmpackc.low %vm405_vm4, %vm405_vm4  ;;  %vm640_vm10 = vcmask 261120   ;;  %vm615_vm11 = vcmask 130048  }
  0x36   :  { %v111_v62 = vsel %vm80_vm13, %v1375_v58, %v110_v57  ;;  %vm1607_vm8 = vcmp.ne.s16.totalorder %v1033_v61, 0  ;;  %v1038_v42 = vcombine.low %v445_v15, %v446_v45  ;;  %vm422_vm0 = vmpackc.low %vm406_vm6, %vm406_vm6  ;;  %v437_v18 = vsel %vm421_vm7, 65537, %v1141_v38 }
  0x37   :  { %v481_v54 = vsel %vm1607_vm8, 0, %v1567_v55  ;;  %v438_v58 = vsel %vm422_vm0, 65537, %v1141_v38  ;;  %vm681_vm12 = vcmask 392192   ;;  %vm951_vm3 = vcmask 1041409  }
  0x38   :  { %vm1616_vm13 = vcmp.ne.s16.totalorder %v1038_v42, 0  ;;  %v1034_v44 = vcombine.low %v437_v18, %v438_v58  ;;  %vm954_vm14 = vcmask 1042434   ;;  %vm957_vm15 = vcmask 1043459  }
  0x39   :  { %v486_v39 = vsel %vm1616_vm13, 0, %v143_v21  ;;  %vm960_vm1 = vcmask 1044484   ;;  %vm963_vm2 = vcmask 1045509   ;;  %vm966_vm4 = vcmask 1046534  }
  0x3a   :  { %vm1622_vm9 = vcmp.ne.s16.totalorder %v1034_v44, 0  ;;  %vm969_vm5 = vcmask 1047559   ;;  %vm1001_vm6 = vcmask 523264   ;;  %vm1004_vm7 = vcmask 588800  }
  0x3b   :  { %v482_v46 = vsel %vm1622_vm9, 0, %v111_v62 }
  0x74   :  { %v578_v9 = vpop.permute.xlu1 %577  ;;  %v576_v0 = vpop.permute.xlu0 %575 }
  0x75   :  { %v618_v29 = vsel %vm615_vm11, %v1538_v28, %v576_v0  ;;  %v621_v37 = vsel %vm615_vm11, %v480_v4, %v578_v9 }
  0x78   :  { %v586_v10 = vpop.permute.xlu1 %585  ;;  %v584_v26 = vpop.permute.xlu0 %583 }
  0x79   :  { %v630_v38 = vsel %vm615_vm11, %v483_v8, %v584_v26  ;;  %v633_v12 = vsel %vm615_vm11, %v484_v14, %v586_v10 }
  0x83   :  { %v608_v20 = vpop.permute.xlu1 %607 }
  0x84   :  { %v650_v22 = vsel %vm640_vm10, %v630_v38, %v608_v20  ;;  %v600_v2 = vpop.permute.xlu0 %599 }
  0x85   :  { %1084 = vmatprep.mubr.msk.bf16.mxu1 %vm681_vm12, %v650_v22  ;;  %v642_v5 = vsel %vm640_vm10, %v618_v29, %v600_v2 }
  0x86   :  { %1076 = vmatprep.mubr.msk.bf16.mxu0 %vm681_vm12, %v642_v5 }
  0x87   :  { %v610_v6 = vpop.permute.xlu1 %609 }
  0x88   :  { %v652_v11 = vsel %vm640_vm10, %v633_v12, %v610_v6 }
  0x89   :  { %1085 = vmatmul.mubr.msk.bf16.vlgmr.msra.gmra.mrb[0].mxu1 %vm681_vm12, %v652_v11 }
  0x8b   :  { %v602_v41 = vpop.permute.xlu0 %601  ;;  %v588_v52 = vpop.permute.xlu1 %587 }
  0x8c   :  { %v644_v47 = vsel %vm640_vm10, %v621_v37, %v602_v41  ;;  %v636_v7 = vsel %vm615_vm11, %v485_v25, %v588_v52  ;;  %v1668_v37 = vld [vmem:[%s1747_s4] ss:$0 sm:$0xff] }
  0x8d   :  { %1077 = vmatmul.mubr.msk.bf16.vlgmr.msra.gmra.mrb[0].mxu0 %vm681_vm12, %v644_v47 }
  0x8f   :  { %v580_v50 = vpop.permute.xlu0 %579  ;;  %v590_v53 = vpop.permute.xlu1 %589 }
  0x90   :  { %v624_v34 = vsel %vm615_vm11, %v481_v54, %v580_v50  ;;  %v639_v4 = vsel %vm615_vm11, %v486_v39, %v590_v53 }
  0x93   :  { %v582_v28 = vpop.permute.xlu0 %581  ;;  %v612_v13 = vpop.permute.xlu1 %611 }
  0x94   :  { %v654_v16 = vsel %vm640_vm10, %v636_v7, %v612_v13  ;;  %v627_v14 = vsel %vm615_vm11, %v482_v46, %v582_v28 }
  0x95   :  { %1088 = vmatprep.mubr.msk.bf16.mxu1 %vm681_vm12, %v654_v16 }
  0x97   :  { %v604_v59 = vpop.permute.xlu0 %603  ;;  %v614_v23 = vpop.permute.xlu1 %613 }
  0x98   :  { %v646_v17 = vsel %vm640_vm10, %v624_v34, %v604_v59  ;;  %v656_v24 = vsel %vm640_vm10, %v639_v4, %v614_v23 }
  0x99   :  { %1080 = vmatprep.mubr.msk.bf16.mxu0 %vm681_vm12, %v646_v17  ;;  %1089 = vmatmul.mubr.msk.bf16.gmra.mrb[4].mxu1 %vm681_vm12, %v656_v24 }
  0x9b   :  { %v606_v30 = vpop.permute.xlu0 %605 }
  0x9c   :  { %v648_v33 = vsel %vm640_vm10, %v627_v14, %v606_v30 }
  0x9d   :  { %1081 = vmatmul.mubr.msk.bf16.gmra.mrb[4].mxu0 %vm681_vm12, %v648_v33 }
 0x15c   :  { %v1086_v51 = vpop.f32.mrb[0].mxu1 }
 0x15d   :  { %v865_v35 = vsel %vm640_vm10, %v1086_v51, -inf  ;;  %v764_v55 = vpop.f32.mrb[1].mxu1 }
 0x15e   :  { %v866_v27 = vrot.slane %v865_v35, 4  ;;  %v851_v1 = vsel %vm640_vm10, %v764_v55, -inf  ;;  %v1087_v3 = vpop.f32.mrb[2].mxu1 }
 0x15f   :  { %v852_v32 = vrot.slane %v851_v1, 4  ;;  %v872_v19 = vsel %vm640_vm10, %v1087_v3, -inf  ;;  %v767_v48 = vpop.f32.mrb[3].mxu1 }
 0x160   :  { %v1078_v31 = vpop.f32.mrb[0].mxu0  ;;  %v867_v60 = vmax.f32 %v865_v35, %v866_v27  ;;  %v873_v57 = vrot.slane %v872_v19, 4  ;;  %v858_v56 = vsel %vm640_vm10, %v767_v48, -inf }
 0x161   :  { %v809_v8 = vsel %vm640_vm10, %v1078_v31, -inf  ;;  %v732_v63 = vpop.f32.mrb[1].mxu0  ;;  %v853_v25 = vmax.f32 %v851_v1, %v852_v32  ;;  %v859_v15 = vrot.slane %v858_v56, 4 }
 0x162   :  { %v810_v43 = vrot.slane %v809_v8, 4  ;;  %v795_v21 = vsel %vm640_vm10, %v732_v63, -inf  ;;  %v1079_v61 = vpop.f32.mrb[2].mxu0  ;;  %v868_v62 = vrot.slane %v867_v60, 2  ;;  %v874_v42 = vmax.f32 %v872_v19, %v873_v57 }
 0x163   :  { %v796_v45 = vrot.slane %v795_v21, 4  ;;  %v816_v49 = vsel %vm640_vm10, %v1079_v61, -inf  ;;  %v735_v18 = vpop.f32.mrb[3].mxu0  ;;  %v854_v58 = vrot.slane %v853_v25, 2  ;;  %v860_v38 = vmax.f32 %v858_v56, %v859_v15 }
 0x164   :  { %v811_v54 = vmax.f32 %v809_v8, %v810_v43  ;;  %v817_v40 = vrot.slane %v816_v49, 4  ;;  %v802_v44 = vsel %vm640_vm10, %v735_v18, -inf  ;;  %v869_v39 = vmax.f32 %v867_v60, %v868_v62 }
 0x165   :  { %v797_v36 = vmax.f32 %v795_v21, %v796_v45  ;;  %v875_v46 = vrot.slane %v874_v42, 2  ;;  %v803_v9 = vrot.slane %v802_v44, 4  ;;  %v855_v10 = vmax.f32 %v853_v25, %v854_v58 }
 0x166   :  { %v812_v0 = vrot.slane %v811_v54, 2  ;;  %v818_v26 = vmax.f32 %v816_v49, %v817_v40  ;;  %v870_v20 = vrot.slane %v869_v39, 1  ;;  %v861_v11 = vrot.slane %v860_v38, 2 }
 0x167   :  { %v798_v22 = vrot.slane %v797_v36, 2  ;;  %v876_v29 = vmax.f32 %v874_v42, %v875_v46  ;;  %v804_v2 = vmax.f32 %v802_v44, %v803_v9  ;;  %v856_v12 = vrot.slane %v855_v10, 1 }
 0x168   :  { %v813_v5 = vmax.f32 %v811_v54, %v812_v0  ;;  %v819_v6 = vrot.slane %v818_v26, 2  ;;  %v871_v41 = vmax.f32 %v869_v39, %v870_v20  ;;  %v862_v7 = vmax.f32 %v860_v38, %v861_v11 }
 0x169   :  { %v799_v47 = vmax.f32 %v797_v36, %v798_v22  ;;  %v877_v52 = vrot.slane %v876_v29, 1  ;;  %v805_v50 = vrot.slane %v804_v2, 2  ;;  %v857_v28 = vmax.f32 %v855_v10, %v856_v12 }
 0x16a   :  { %v814_v53 = vrot.slane %v813_v5, 1  ;;  %v820_v16 = vmax.f32 %v818_v26, %v819_v6  ;;  %v1671_v59 = vadd.f32 %v1668_v37, %v871_v41  ;;  %v863_v17 = vrot.slane %v862_v7, 1 }
 0x16b   :  { %v800_v13 = vrot.slane %v799_v47, 1  ;;  %v806_v34 = vmax.f32 %v804_v2, %v805_v50  ;;  %v878_v4 = vmax.f32 %v876_v29, %v877_v52  ;;  %v922_v30 = vadd.f32 %v1668_v37, %v857_v28 }
 0x16c   :  { %v1090_v24 = vpop.f32.mrb[4].mxu1  ;;  %v815_v14 = vmax.f32 %v813_v5, %v814_v53  ;;  %v864_v33 = vmax.f32 %v862_v7, %v863_v17  ;;  %v821_v27 = vrot.slane %v820_v16, 1  ;;  %v973_v32 = vrot.slane %v1671_v59, 6 }
 0x16d   :  { %v807_v23 = vrot.slane %v806_v34, 1  ;;  %v893_v51 = vsel %vm640_vm10, %v1090_v24, -inf  ;;  %v780_v35 = vpop.f32.mrb[5].mxu1  ;;  %v801_v55 = vmax.f32 %v799_v47, %v800_v13  ;;  %v1677_v19 = vadd.f32 %v1668_v37, %v878_v4 }
 0x16e   :  { %v894_v3 = vrot.slane %v893_v51, 4  ;;  %v1091_v31 = vpop.f32.mrb[6].mxu1  ;;  %v923_v48 = vadd.f32 %v1668_v37, %v864_v33  ;;  %v879_v8 = vsel %vm640_vm10, %v780_v35, -inf  ;;  %v1684_v25 = vadd.f32 %v1668_v37, %v815_v14 }
 0x16f   :  { %v808_v1 = vmax.f32 %v806_v34, %v807_v23  ;;  %v783_v60 = vpop.f32.mrb[7].mxu1  ;;  %v880_v43 = vrot.slane %v879_v8, 4  ;;  %v900_v21 = vsel %vm640_vm10, %v1091_v31, -inf  ;;  %v914_v49 = vadd.f32 %v1668_v37, %v801_v55 }
 0x170   :  { %v1082_v57 = vpop.f32.mrb[4].mxu0  ;;  %v895_v56 = vmax.f32 %v893_v51, %v894_v3  ;;  %v971_v61 = vrot.slane %v923_v48, 7  ;;  %v901_v45 = vrot.slane %v900_v21, 4  ;;  %v822_v2 = vmax.f32 %v820_v16, %v821_v27 }
 0x171   :  { %v915_v63 = vadd.f32 %v1668_v37, %v808_v1  ;;  %v837_v15 = vsel %vm640_vm10, %v1082_v57, -inf  ;;  %v748_v62 = vpop.f32.mrb[5].mxu0  ;;  %v881_v39 = vmax.f32 %v879_v8, %v880_v43  ;;  %v886_v52 = vsel %vm640_vm10, %v783_v60, -inf }
 0x172   :  { %v838_v18 = vrot.slane %v837_v15, 4  ;;  %v823_v54 = vsel %vm640_vm10, %v748_v62, -inf  ;;  %v1083_v58 = vpop.f32.mrb[6].mxu0  ;;  %v972_v40 = vsel %vm951_vm3, %v971_v61, %v922_v30  ;;  %v896_v10 = vrot.slane %v895_v56, 2 }
 0x173   :  { %v950_v42 = vrot.slane %v915_v63, 7  ;;  %v824_v44 = vrot.slane %v823_v54, 4  ;;  %v844_v36 = vsel %vm640_vm10, %v1083_v58, -inf  ;;  %v751_v46 = vpop.f32.mrb[7].mxu0  ;;  %v882_v20 = vrot.slane %v881_v39, 2 }
 0x174   :  { %v839_v0 = vmax.f32 %v837_v15, %v838_v18  ;;  %v845_v26 = vrot.slane %v844_v36, 4  ;;  %v902_v22 = vmax.f32 %v900_v21, %v901_v45  ;;  %v830_v29 = vsel %vm640_vm10, %v751_v46, -inf }
 0x175   :  { %v952_v9 = vsel %vm951_vm3, %v950_v42, %v914_v49  ;;  %v825_v38 = vmax.f32 %v823_v54, %v824_v44  ;;  %v831_v6 = vrot.slane %v830_v29, 4  ;;  %v883_v41 = vmax.f32 %v881_v39, %v882_v20 }
 0x176   :  { %v840_v5 = vrot.slane %v839_v0, 2  ;;  %v846_v12 = vmax.f32 %v844_v36, %v845_v26  ;;  %v903_v47 = vrot.slane %v902_v22, 2  ;;  %v897_v53 = vmax.f32 %v895_v56, %v896_v10 }
 0x177   :  { %v826_v11 = vrot.slane %v825_v38, 2  ;;  %v832_v7 = vmax.f32 %v830_v29, %v831_v6  ;;  %v884_v34 = vrot.slane %v883_v41, 1  ;;  %v887_v17 = vrot.slane %v886_v52, 4 }
 0x178   :  { %v841_v50 = vmax.f32 %v839_v0, %v840_v5  ;;  %v847_v28 = vrot.slane %v846_v12, 2  ;;  %v904_v4 = vmax.f32 %v902_v22, %v903_v47  ;;  %v975_v23 = vrot.slane %v1677_v19, 5 }
 0x179   :  { %v827_v13 = vmax.f32 %v825_v38, %v826_v11  ;;  %v833_v14 = vrot.slane %v832_v7, 2  ;;  %v917_v30 = vadd.f32 %v1668_v37, %v822_v2  ;;  %v885_v51 = vmax.f32 %v883_v41, %v884_v34  ;;  %v932_v41 = vld [vmem:[%s1744_s1] sm:$0xff] }
 0x17a   :  { %v842_v16 = vrot.slane %v841_v50, 1  ;;  %v848_v24 = vmax.f32 %v846_v12, %v847_v28  ;;  %v888_v35 = vmax.f32 %v886_v52, %v887_v17  ;;  %v898_v55 = vrot.slane %v897_v53, 1  ;;  %v931_v28 = vld [vmem:[%s1743_s0 + $0x8] sm:$0xff] }
 0x17b   :  { %v828_v33 = vrot.slane %v827_v13, 1  ;;  %v905_v1 = vrot.slane %v904_v4, 1  ;;  %v834_v3 = vmax.f32 %v832_v7, %v833_v14  ;;  %v926_v8 = vadd.f32 %v1668_v37, %v885_v51 }
 0x17c   :  { %v849_v27 = vrot.slane %v848_v24, 1  ;;  %v843_v31 = vmax.f32 %v841_v50, %v842_v16  ;;  %v889_v60 = vrot.slane %v888_v35, 2  ;;  %v953_v63 = vrot.slane %v1684_v25, 6  ;;  %v930_v50 = vld [vmem:[%s1743_s0] sm:$0xff] }
 0x17d   :  { %v829_v48 = vmax.f32 %v827_v13, %v828_v33  ;;  %v835_v57 = vrot.slane %v834_v3, 1  ;;  %v974_v56 = vsel %vm954_vm14, %v973_v32, %v972_v40  ;;  %v956_v43 = vrot.slane %v917_v30, 5 }
 0x17e   :  { %v850_v19 = vmax.f32 %v848_v24, %v849_v27  ;;  %v977_v61 = vrot.slane %v926_v8, 4  ;;  %v890_v15 = vmax.f32 %v888_v35, %v889_v60  ;;  %v899_v62 = vmax.f32 %v897_v53, %v898_v55 }
 0x17f   :  { %v918_v21 = vadd.f32 %v1668_v37, %v829_v48  ;;  %v906_v45 = vmax.f32 %v904_v4, %v905_v1  ;;  %v836_v49 = vmax.f32 %v834_v3, %v835_v57  ;;  %v976_v42 = vsel %vm957_vm15, %v975_v23, %v974_v56 }
 0x180   :  { %v920_v18 = vadd.f32 %v1668_v37, %v843_v31  ;;  %v891_v25 = vrot.slane %v890_v15, 1  ;;  %v978_v58 = vsel %vm960_vm1, %v977_v61, %v976_v42  ;;  %v921_v32 = vadd.f32 %v1668_v37, %v850_v19 }
 0x181   :  { %v959_v54 = vrot.slane %v918_v21, 4  ;;  %v919_v59 = vadd.f32 %v1668_v37, %v836_v49  ;;  %v955_v40 = vsel %vm954_vm14, %v953_v63, %v952_v9  ;;  %v928_v36 = vadd.f32 %v1668_v37, %v899_v62 }
 0x182   :  { %v892_v44 = vmax.f32 %v890_v15, %v891_v25  ;;  %v958_v39 = vsel %vm957_vm15, %v956_v43, %v955_v40  ;;  %v965_v10 = vrot.slane %v920_v18, 2  ;;  %v929_v38 = vadd.f32 %v1668_v37, %v906_v45 }
 0x183   :  { %v962_v46 = vrot.slane %v919_v59, 3  ;;  %v961_v0 = vsel %vm960_vm1, %v959_v54, %v958_v39  ;;  %v968_v22 = vrot.slane %v921_v32, 1  ;;  %v981_v2 = vrot.slane %v928_v36, 2 }
 0x184   :  { %v927_v26 = vadd.f32 %v1668_v37, %v892_v44  ;;  %v983_v6 = vrot.slane %v929_v38, 1  ;;  %v933_v37 = vld [vmem:[%s1744_s1 + $0x8] sm:$0xff]  ;;  %s1012_s1 = sshll.u32 %s1144_s25, 4  ;;  %s1013_s1 = int_to_ptr.vmem [resolvable:$true] %s1012_s1 }
 0x185   :  { %v964_v20 = vsel %vm963_vm2, %v962_v46, %v961_v0  ;;  %s1116_s26 = scalar_lea.vmem %s1013_s1, 256  ;;  %p1121_p1 = scmp.lt.s32.totalorder %s1013_s1, %s1013_s1 }
 0x186   :  { %v979_v9 = vrot.slane %v927_v26, 3  ;;  %v967_v29 = vsel %vm966_vm4, %v965_v10, %v964_v20  ;;  %p1117_p0 = scmp.ne.s32.totalorder %s1013_s1, %s1116_s26  ;;  %p1122_p2 = scmp.lt.s32.totalorder %s1116_s26, %s1116_s26 }
 0x187   :  { %v970_v5 = vsel %vm969_vm5, %v968_v22, %v967_v29 }
 0x188   :  { %v980_v12 = vsel %vm963_vm2, %v979_v9, %v978_v58  ;;  %985 = vrot.lane.b32.xlu0 %v970_v5, %s1142_s3  ;;  %p1123_p3 = por %p1122_p2, %p1121_p1 }
 0x189   :  { %v982_v11 = vsel %vm966_vm4, %v981_v2, %v980_v12 }
 0x18a   :  { %v984_v47 = vsel %vm969_vm5, %v983_v6, %v982_v11  ;;  %p1124_p4 = pnand %p1123_p3, %p1117_p0 }
 0x18b   :  { %987 = vrot.lane.b32.xlu1 %v984_v47, %s1142_s3 }
 0x18c   :  { %993 = vrot.lane.b32.xlu0 %v932_v41, %s1143_s20 }
 0x18f   :  { %995 = vrot.lane.b32.xlu1 %v933_v37, %s1143_s20 }
 0x1fa   :  { %v986_v52 = vpop.permute.xlu0 %985 }
 0x1fb   :  { %v999_v7 = vsel %vm640_vm10, %v930_v50, %v986_v52 }
 0x1fd   :  { %v988_v53 = vpop.permute.xlu1 %987 }
 0x1fe   :  { %v994_v13 = vpop.permute.xlu0 %993  ;;  %v1000_v4 = vsel %vm640_vm10, %v931_v28, %v988_v53 }
 0x1ff   :  { %v1002_v34 = vsel %vm1001_vm6, %v999_v7, %v994_v13 }
 0x200   :  { %1005 = vst.msk [vmem:[#allocation2] sm:$0xff] %vm1004_vm7, %v1002_v34 }
 0x201   :  { %v996_v17 = vpop.permute.xlu1 %995 }
 0x202   :  { %v1003_v23 = vsel %vm1001_vm6, %v1000_v4, %v996_v17 }
 0x203   :  { %1006 = vst.msk [vmem:[#allocation2 + $0x8] sm:$0xff] %vm1004_vm7, %v1003_v23 }
 0x204   :  { %1127 = shalt.err (!%p1124_p4)
}
 0x205   :  { %s1128_s28 = scalar_lea.hbm %s1748_s5, 256 }
 0x206   :  { %p1129_p5 = scmp.ne.s32.totalorder %s1748_s5, %s1128_s28  ;;  %p1132_p6 = scmp.lt.u32.totalorder %s1128_s28, %s1748_s5 }
 0x208   :  { %p1134_p7 = pnand %p1132_p6, %p1129_p5 }
 0x20a   :  { %1137 = shalt.err (!%p1134_p7)
}
 0x20b   :  { %s1145_s8 = smov 128   ;;  %s1146_s9 = smov 8  }
 0x20c   :  { %1018 = dma.vmem_to_hbm [thread:$0]  %s1013_s1, 256, %s1748_s5, [#allocation3], %s1145_s8, %s1145_s8, %s1146_s9  }
 0x20d   :  { %1138 = dma.done.wait [#allocation3], 256  }
 0x20e   :  { %1139 = vsyncadd [#allocation3], 4294967040 }
 0x20f   :  { %1022 = vsyncpa [#allocation3], 1 }

</bundles_post_ra>
